<compile_context>
chip_gen: v7x
topology: tpu7x:2x2x1
jax: 0.10.0
libtpu: 0.0.40
codegen_flags: <defaults>
</compile_context>

<pallas_src>
import functools

import jax
import jax.numpy as jnp
from jax.experimental import pallas as pl
from jax.experimental.pallas import tpu as pltpu


# ----------------------------------------------------------------------------
# Fused Pallas kernel: whole ShuffleBlock (stride 1) for one batch image
# ----------------------------------------------------------------------------
def _fused_shuffle_block_kernel(x_ref, w1_ref, b1_ref, wdw_ref, bdw_ref,
                                w3_ref, b3_ref, o_ref, yp_ref, *, H, W):
    mid = w1_ref.shape[1]

    x2d = x_ref[0]                                           # (H*W, Cin)

    # --- conv1 (1x1) + BN1 + ReLU + channel shuffle (BN/shuffle pre-folded) --
    y2d = jnp.dot(x2d, w1_ref[...], preferred_element_type=jnp.float32)
    y2d = jnp.maximum(y2d + b1_ref[...], 0.0)                # (H*W, mid)

    # --- depthwise 3x3, stride 1, pad 1 (BN2 pre-folded) ---------------------
    # Build the zero halo in a VMEM scratch buffer (no HBM round trip).
    yp_ref[...] = jnp.zeros((H + 2, W + 2, mid), jnp.float32)
    yp_ref[1:H + 1, 1:W + 1, :] = y2d.reshape(H, W, mid)
    yp = yp_ref[...]                                         # (H+2, W+2, mid)
    wdw = wdw_ref[...]                                       # (3, 3, mid)
    acc = jnp.zeros((H, W, mid), jnp.float32)
    for kh in range(3):            # static tap loop -> 9 VPU multiply-adds
        for kw in range(3):
            acc = acc + yp[kh:kh + H, kw:kw + W, :] * wdw[kh, kw, :]
    z2d = (acc + bdw_ref[...]).reshape(H * W, mid)           # (H*W, mid)

    # --- conv3 (1x1) + BN3 + identity shortcut + ReLU ------------------------
    out = jnp.dot(z2d, w3_ref[...], preferred_element_type=jnp.float32)
    out = out + b3_ref[...] + x2d                            # residual add
    o_ref[0] = jnp.maximum(out, 0.0).astype(o_ref.dtype)


# ----------------------------------------------------------------------------
# Forward pass wrapper (single pallas_call; only layout plumbing outside)
# ----------------------------------------------------------------------------
def shuffle_block_forward(x_nchw, fp):
    """x_nchw: (B, C, H, W) float32; fp: folded params (see fold_params)."""
    x = jnp.transpose(x_nchw, (0, 2, 3, 1)).astype(jnp.float32)   # NHWC
    B, H, W, Cin = x.shape
    mid = fp["w1"].shape[1]
    Cout = fp["w3"].shape[1]
    assert Cin == Cout, "identity shortcut requires in_feature == out_feature"

    x3d = x.reshape(B, H * W, Cin)        # bit-free reshape; channels on lanes

    out3d = pl.pallas_call(
        functools.partial(_fused_shuffle_block_kernel, H=H, W=W),
        out_shape=jax.ShapeDtypeStruct((B, H * W, Cout), jnp.float32),
        grid=(B,),
        in_specs=[
            pl.BlockSpec((1, H * W, Cin), lambda b: (b, 0, 0)),   # activations
            pl.BlockSpec((Cin, mid), lambda b: (0, 0)),           # w1 (folded)
            pl.BlockSpec((1, mid), lambda b: (0, 0)),             # b1 (folded)
            pl.BlockSpec((3, 3, mid), lambda b: (0, 0, 0)),       # wdw (folded)
            pl.BlockSpec((1, 1, mid), lambda b: (0, 0, 0)),       # bdw (folded)
            pl.BlockSpec((mid, Cout), lambda b: (0, 0)),          # w3 (folded)
            pl.BlockSpec((1, Cout), lambda b: (0, 0)),            # b3 (folded)
        ],
        out_specs=pl.BlockSpec((1, H * W, Cout), lambda b: (b, 0, 0)),
        scratch_shapes=[pltpu.VMEM((H + 2, W + 2, mid), jnp.float32)],
        compiler_params=pltpu.CompilerParams(
            dimension_semantics=("parallel",)),
    )(x3d, fp["w1"], fp["b1"], fp["wdw"], fp["bdw"], fp["w3"], fp["b3"])

    return jnp.transpose(out3d.reshape(B, H, W, Cout), (0, 3, 1, 2))  # NCHW


# ----------------------------------------------------------------------------
# Deterministic parameter construction + one-time folding
# ----------------------------------------------------------------------------
def make_params(key, in_feature, out_feature, eps=1e-5):
    mid = out_feature // 4
    ks = jax.random.split(key, 18)

    def bn_stats(kg, kb, km, kv, c):
        gamma = jax.random.uniform(kg, (c,), jnp.float32, 0.5, 1.5)
        beta = 0.1 * jax.random.normal(kb, (c,), jnp.float32)
        mean = 0.1 * jax.random.normal(km, (c,), jnp.float32)
        var = jax.random.uniform(kv, (c,), jnp.float32, 0.5, 1.5)
        scale = gamma / jnp.sqrt(var + eps)
        shift = beta - mean * scale
        return scale, shift

    bn1_scale, bn1_shift = bn_stats(ks[6], ks[7], ks[8], ks[9], mid)
    bn2_scale, bn2_shift = bn_stats(ks[10], ks[11], ks[12], ks[13], mid)
    bn3_scale, bn3_shift = bn_stats(ks[14], ks[15], ks[16], ks[17], out_feature)

    return {
        # conv1: PyTorch (mid, Cin, 1, 1) -> matmul form (Cin, mid)
        "w1": 0.1 * jax.random.normal(ks[0], (in_feature, mid), jnp.float32),
        "b1": 0.05 * jax.random.normal(ks[1], (mid,), jnp.float32),
        # dwconv: PyTorch (mid, 1, 3, 3) -> NHWC form (3, 3, mid)
        "wdw": 0.1 * jax.random.normal(ks[2], (3, 3, mid), jnp.float32),
        "bdw": 0.05 * jax.random.normal(ks[3], (mid,), jnp.float32),
        # conv3: PyTorch (Cout, mid, 1, 1) -> matmul form (mid, Cout)
        # (distinct keys -- previous version reused conv1's keys)
        "w3": 0.1 * jax.random.normal(ks[4], (mid, out_feature), jnp.float32),
        "b3": 0.05 * jax.random.normal(ks[5], (out_feature,), jnp.float32),
        "bn1_scale": bn1_scale, "bn1_shift": bn1_shift,
        "bn2_scale": bn2_scale, "bn2_shift": bn2_shift,
        "bn3_scale": bn3_scale, "bn3_shift": bn3_shift,
    }


def fold_params(params, g):
    """Fold inference-mode BatchNorm and the channel shuffle into conv params."""
    mid = params["w1"].shape[1]
    assert mid % g == 0
    # Channel shuffle == fixed permutation of conv1's output channels:
    # shuffled[c_new] = y[perm[c_new]]
    perm = jnp.arange(mid).reshape(g, mid // g).T.reshape(-1)

    w1 = (params["w1"] * params["bn1_scale"])[:, perm]
    b1 = (params["b1"] * params["bn1_scale"] + params["bn1_shift"])[perm]
    wdw = params["wdw"] * params["bn2_scale"]
    bdw = params["bdw"] * params["bn2_scale"] + params["bn2_shift"]
    w3 = params["w3"] * params["bn3_scale"]
    b3 = params["b3"] * params["bn3_scale"] + params["bn3_shift"]
    cout = w3.shape[1]
    return {
        "w1": w1, "b1": b1.reshape(1, mid),
        "wdw": wdw, "bdw": bdw.reshape(1, 1, mid),
        "w3": w3, "b3": b3.reshape(1, cout),
    }


if __name__ == "__main__":
    # ShuffleBlock(in_feature=32, out_feature=32, stride=1, g=4, downsample=id)
    B, C, H, W = 2, 32, 8, 8
    g = 4

    key = jax.random.PRNGKey(0)
    k_x, k_p = jax.random.split(key)
    x = jax.random.normal(k_x, (B, C, H, W), jnp.float32)   # NCHW like PyTorch
    params = make_params(k_p, in_feature=C, out_feature=C)
    fparams = fold_params(params, g)                         # one-time prep

    fwd = jax.jit(lambda xx: shuffle_block_forward(xx, fparams))
    out = fwd(x)
    jax.block_until_ready(out)
    assert out.shape == (B, C, H, W)
    print("KERNEL_OK")
</pallas_src>

<mosaic_0001>
module attributes {stable_mosaic.version = 11 : i64} {
  func.func @_fused_shuffle_block_kernel(%arg0: i32, %arg1: memref<1x64x32xf32, #tpu.memory_space<vmem>>, %arg2: memref<32x8xf32, #tpu.memory_space<vmem>>, %arg3: memref<1x8xf32, #tpu.memory_space<vmem>>, %arg4: memref<3x3x8xf32, #tpu.memory_space<vmem>>, %arg5: memref<1x1x8xf32, #tpu.memory_space<vmem>>, %arg6: memref<8x32xf32, #tpu.memory_space<vmem>>, %arg7: memref<1x32xf32, #tpu.memory_space<vmem>>, %arg8: memref<1x64x32xf32, #tpu.memory_space<vmem>>, %arg9: memref<10x10x8xf32, #tpu.memory_space<vmem>>) attributes {dimension_semantics = [#tpu.dimension_semantics<parallel>], iteration_bounds = array<i64: 2>, scalar_prefetch = 0 : i64, scratch_operands = 1 : i64, tpu.core_type = #tpu.core_type<tc>, window_params = [{transform_indices = @transform_0, window_bounds = array<i64: 1, 64, 32>}, {pipeline_mode = #tpu.pipeline_mode<synchronous>, transform_indices = @transform_1, window_bounds = array<i64: 32, 8>}, {pipeline_mode = #tpu.pipeline_mode<synchronous>, transform_indices = @transform_2, window_bounds = array<i64: 1, 8>}, {pipeline_mode = #tpu.pipeline_mode<synchronous>, transform_indices = @transform_3, window_bounds = array<i64: 3, 3, 8>}, {pipeline_mode = #tpu.pipeline_mode<synchronous>, transform_indices = @transform_4, window_bounds = array<i64: 1, 1, 8>}, {pipeline_mode = #tpu.pipeline_mode<synchronous>, transform_indices = @transform_5, window_bounds = array<i64: 8, 32>}, {pipeline_mode = #tpu.pipeline_mode<synchronous>, transform_indices = @transform_6, window_bounds = array<i64: 1, 32>}, {transform_indices = @transform_7, window_bounds = array<i64: 1, 64, 32>}]} {
    %c0 = arith.constant 0 : index
    %c0_0 = arith.constant 0 : index
    %c0_1 = arith.constant 0 : index
    %0 = vector.load %arg1[%c0, %c0_0, %c0_1] : memref<1x64x32xf32, #tpu.memory_space<vmem>>, vector<1x64x32xf32>
    %1 = vector.shape_cast %0 : vector<1x64x32xf32> to vector<64x32xf32>
    %c0_2 = arith.constant 0 : index
    %c0_3 = arith.constant 0 : index
    %2 = vector.load %arg2[%c0_2, %c0_3] : memref<32x8xf32, #tpu.memory_space<vmem>>, vector<32x8xf32>
    %cst = arith.constant dense<0.000000e+00> : vector<64x8xf32>
    %3 = tpu.matmul %1, %2, %cst {dimension_numbers = #tpu.dot_dimension_numbers<[1], [0], [0], [1], [0, 0, 1, 1], [], []>} : vector<64x32xf32>, vector<32x8xf32>, vector<64x8xf32> -> vector<64x8xf32>
    %c0_4 = arith.constant 0 : index
    %c0_5 = arith.constant 0 : index
    %4 = vector.load %arg3[%c0_4, %c0_5] : memref<1x8xf32, #tpu.memory_space<vmem>>, vector<1x8xf32>
    %5 = vector.broadcast %4 : vector<1x8xf32> to vector<64x8xf32>
    %6 = arith.addf %3, %5 : vector<64x8xf32>
    %cst_6 = arith.constant 0.000000e+00 : f32
    %7 = vector.broadcast %cst_6 : f32 to vector<64x8xf32>
    %8 = arith.maximumf %6, %7 : vector<64x8xf32>
    %cst_7 = arith.constant 0.000000e+00 : f32
    %9 = vector.broadcast %cst_7 : f32 to vector<10x10x8xf32>
    %c0_8 = arith.constant 0 : index
    %c0_9 = arith.constant 0 : index
    %c0_10 = arith.constant 0 : index
    %10 = vector.load %arg9[%c0_8, %c0_9, %c0_10] : memref<10x10x8xf32, #tpu.memory_space<vmem>>, vector<10x10x8xf32>
    tpu.vector_store %arg9[%c0_8, %c0_9, %c0_10], %9 {strides = array<i32>} : memref<10x10x8xf32, #tpu.memory_space<vmem>>, vector<10x10x8xf32>,
    %11 = vector.shape_cast %8 : vector<64x8xf32> to vector<8x8x8xf32>
    %c1 = arith.constant 1 : index
    %c1_11 = arith.constant 1 : index
    %c0_12 = arith.constant 0 : index
    %12 = vector.load %arg9[%c1, %c1_11, %c0_12] : memref<10x10x8xf32, #tpu.memory_space<vmem>>, vector<8x8x8xf32>
    tpu.vector_store %arg9[%c1, %c1_11, %c0_12], %11 {strides = array<i32>} : memref<10x10x8xf32, #tpu.memory_space<vmem>>, vector<8x8x8xf32>,
    %c0_13 = arith.constant 0 : index
    %c0_14 = arith.constant 0 : index
    %c0_15 = arith.constant 0 : index
    %13 = vector.load %arg9[%c0_13, %c0_14, %c0_15] : memref<10x10x8xf32, #tpu.memory_space<vmem>>, vector<10x10x8xf32>
    %c0_16 = arith.constant 0 : index
    %c0_17 = arith.constant 0 : index
    %c0_18 = arith.constant 0 : index
    %14 = vector.load %arg4[%c0_16, %c0_17, %c0_18] : memref<3x3x8xf32, #tpu.memory_space<vmem>>, vector<3x3x8xf32>
    %cst_19 = arith.constant 0.000000e+00 : f32
    %15 = vector.broadcast %cst_19 : f32 to vector<8x8x8xf32>
    %16 = vector.extract_strided_slice %13 {offsets = [0, 0, 0], sizes = [8, 8, 8], strides = [1, 1, 1]} : vector<10x10x8xf32> to vector<8x8x8xf32>
    %17 = vector.extract_strided_slice %14 {offsets = [0, 0, 0], sizes = [1, 1, 8], strides = [1, 1, 1]} : vector<3x3x8xf32> to vector<1x1x8xf32>
    %18 = vector.shape_cast %17 : vector<1x1x8xf32> to vector<8xf32>
    %19 = vector.shape_cast %18 : vector<8xf32> to vector<1x1x8xf32>
    %20 = vector.broadcast %19 : vector<1x1x8xf32> to vector<8x8x8xf32>
    %21 = arith.mulf %16, %20 : vector<8x8x8xf32>
    %22 = arith.addf %15, %21 : vector<8x8x8xf32>
    %23 = vector.extract_strided_slice %13 {offsets = [0, 1, 0], sizes = [8, 8, 8], strides = [1, 1, 1]} : vector<10x10x8xf32> to vector<8x8x8xf32>
    %24 = vector.extract_strided_slice %14 {offsets = [0, 1, 0], sizes = [1, 1, 8], strides = [1, 1, 1]} : vector<3x3x8xf32> to vector<1x1x8xf32>
    %25 = vector.shape_cast %24 : vector<1x1x8xf32> to vector<8xf32>
    %26 = vector.shape_cast %25 : vector<8xf32> to vector<1x1x8xf32>
    %27 = vector.broadcast %26 : vector<1x1x8xf32> to vector<8x8x8xf32>
    %28 = arith.mulf %23, %27 : vector<8x8x8xf32>
    %29 = arith.addf %22, %28 : vector<8x8x8xf32>
    %30 = vector.extract_strided_slice %13 {offsets = [0, 2, 0], sizes = [8, 8, 8], strides = [1, 1, 1]} : vector<10x10x8xf32> to vector<8x8x8xf32>
    %31 = vector.extract_strided_slice %14 {offsets = [0, 2, 0], sizes = [1, 1, 8], strides = [1, 1, 1]} : vector<3x3x8xf32> to vector<1x1x8xf32>
    %32 = vector.shape_cast %31 : vector<1x1x8xf32> to vector<8xf32>
    %33 = vector.shape_cast %32 : vector<8xf32> to vector<1x1x8xf32>
    %34 = vector.broadcast %33 : vector<1x1x8xf32> to vector<8x8x8xf32>
    %35 = arith.mulf %30, %34 : vector<8x8x8xf32>
    %36 = arith.addf %29, %35 : vector<8x8x8xf32>
    %37 = vector.extract_strided_slice %13 {offsets = [1, 0, 0], sizes = [8, 8, 8], strides = [1, 1, 1]} : vector<10x10x8xf32> to vector<8x8x8xf32>
    %38 = vector.extract_strided_slice %14 {offsets = [1, 0, 0], sizes = [1, 1, 8], strides = [1, 1, 1]} : vector<3x3x8xf32> to vector<1x1x8xf32>
    %39 = vector.shape_cast %38 : vector<1x1x8xf32> to vector<8xf32>
    %40 = vector.shape_cast %39 : vector<8xf32> to vector<1x1x8xf32>
    %41 = vector.broadcast %40 : vector<1x1x8xf32> to vector<8x8x8xf32>
    %42 = arith.mulf %37, %41 : vector<8x8x8xf32>
    %43 = arith.addf %36, %42 : vector<8x8x8xf32>
    %44 = vector.extract_strided_slice %13 {offsets = [1, 1, 0], sizes = [8, 8, 8], strides = [1, 1, 1]} : vector<10x10x8xf32> to vector<8x8x8xf32>
    %45 = vector.extract_strided_slice %14 {offsets = [1, 1, 0], sizes = [1, 1, 8], strides = [1, 1, 1]} : vector<3x3x8xf32> to vector<1x1x8xf32>
    %46 = vector.shape_cast %45 : vector<1x1x8xf32> to vector<8xf32>
    %47 = vector.shape_cast %46 : vector<8xf32> to vector<1x1x8xf32>
    %48 = vector.broadcast %47 : vector<1x1x8xf32> to vector<8x8x8xf32>
    %49 = arith.mulf %44, %48 : vector<8x8x8xf32>
    %50 = arith.addf %43, %49 : vector<8x8x8xf32>
    %51 = vector.extract_strided_slice %13 {offsets = [1, 2, 0], sizes = [8, 8, 8], strides = [1, 1, 1]} : vector<10x10x8xf32> to vector<8x8x8xf32>
    %52 = vector.extract_strided_slice %14 {offsets = [1, 2, 0], sizes = [1, 1, 8], strides = [1, 1, 1]} : vector<3x3x8xf32> to vector<1x1x8xf32>
    %53 = vector.shape_cast %52 : vector<1x1x8xf32> to vector<8xf32>
    %54 = vector.shape_cast %53 : vector<8xf32> to vector<1x1x8xf32>
    %55 = vector.broadcast %54 : vector<1x1x8xf32> to vector<8x8x8xf32>
    %56 = arith.mulf %51, %55 : vector<8x8x8xf32>
    %57 = arith.addf %50, %56 : vector<8x8x8xf32>
    %58 = vector.extract_strided_slice %13 {offsets = [2, 0, 0], sizes = [8, 8, 8], strides = [1, 1, 1]} : vector<10x10x8xf32> to vector<8x8x8xf32>
    %59 = vector.extract_strided_slice %14 {offsets = [2, 0, 0], sizes = [1, 1, 8], strides = [1, 1, 1]} : vector<3x3x8xf32> to vector<1x1x8xf32>
    %60 = vector.shape_cast %59 : vector<1x1x8xf32> to vector<8xf32>
    %61 = vector.shape_cast %60 : vector<8xf32> to vector<1x1x8xf32>
    %62 = vector.broadcast %61 : vector<1x1x8xf32> to vector<8x8x8xf32>
    %63 = arith.mulf %58, %62 : vector<8x8x8xf32>
    %64 = arith.addf %57, %63 : vector<8x8x8xf32>
    %65 = vector.extract_strided_slice %13 {offsets = [2, 1, 0], sizes = [8, 8, 8], strides = [1, 1, 1]} : vector<10x10x8xf32> to vector<8x8x8xf32>
    %66 = vector.extract_strided_slice %14 {offsets = [2, 1, 0], sizes = [1, 1, 8], strides = [1, 1, 1]} : vector<3x3x8xf32> to vector<1x1x8xf32>
    %67 = vector.shape_cast %66 : vector<1x1x8xf32> to vector<8xf32>
    %68 = vector.shape_cast %67 : vector<8xf32> to vector<1x1x8xf32>
    %69 = vector.broadcast %68 : vector<1x1x8xf32> to vector<8x8x8xf32>
    %70 = arith.mulf %65, %69 : vector<8x8x8xf32>
    %71 = arith.addf %64, %70 : vector<8x8x8xf32>
    %72 = vector.extract_strided_slice %13 {offsets = [2, 2, 0], sizes = [8, 8, 8], strides = [1, 1, 1]} : vector<10x10x8xf32> to vector<8x8x8xf32>
    %73 = vector.extract_strided_slice %14 {offsets = [2, 2, 0], sizes = [1, 1, 8], strides = [1, 1, 1]} : vector<3x3x8xf32> to vector<1x1x8xf32>
    %74 = vector.shape_cast %73 : vector<1x1x8xf32> to vector<8xf32>
    %75 = vector.shape_cast %74 : vector<8xf32> to vector<1x1x8xf32>
    %76 = vector.broadcast %75 : vector<1x1x8xf32> to vector<8x8x8xf32>
    %77 = arith.mulf %72, %76 : vector<8x8x8xf32>
    %78 = arith.addf %71, %77 : vector<8x8x8xf32>
    %c0_20 = arith.constant 0 : index
    %c0_21 = arith.constant 0 : index
    %c0_22 = arith.constant 0 : index
    %79 = vector.load %arg5[%c0_20, %c0_21, %c0_22] : memref<1x1x8xf32, #tpu.memory_space<vmem>>, vector<1x1x8xf32>
    %80 = vector.broadcast %79 : vector<1x1x8xf32> to vector<8x8x8xf32>
    %81 = arith.addf %78, %80 : vector<8x8x8xf32>
    %82 = vector.shape_cast %81 : vector<8x8x8xf32> to vector<64x8xf32>
    %c0_23 = arith.constant 0 : index
    %c0_24 = arith.constant 0 : index
    %83 = vector.load %arg6[%c0_23, %c0_24] : memref<8x32xf32, #tpu.memory_space<vmem>>, vector<8x32xf32>
    %cst_25 = arith.constant dense<0.000000e+00> : vector<64x32xf32>
    %84 = tpu.matmul %82, %83, %cst_25 {dimension_numbers = #tpu.dot_dimension_numbers<[1], [0], [0], [1], [0, 0, 1, 1], [], []>} : vector<64x8xf32>, vector<8x32xf32>, vector<64x32xf32> -> vector<64x32xf32>
    %c0_26 = arith.constant 0 : index
    %c0_27 = arith.constant 0 : index
    %85 = vector.load %arg7[%c0_26, %c0_27] : memref<1x32xf32, #tpu.memory_space<vmem>>, vector<1x32xf32>
    %86 = vector.broadcast %85 : vector<1x32xf32> to vector<64x32xf32>
    %87 = arith.addf %84, %86 : vector<64x32xf32>
    %88 = arith.addf %87, %1 : vector<64x32xf32>
    %cst_28 = arith.constant 0.000000e+00 : f32
    %89 = vector.broadcast %cst_28 : f32 to vector<64x32xf32>
    %90 = arith.maximumf %88, %89 : vector<64x32xf32>
    %c0_29 = arith.constant 0 : index
    %c0_30 = arith.constant 0 : index
    %c0_31 = arith.constant 0 : index
    %91 = vector.load %arg8[%c0_29, %c0_30, %c0_31] : memref<1x64x32xf32, #tpu.memory_space<vmem>>, vector<1x64x32xf32>
    %92 = vector.shape_cast %91 : vector<1x64x32xf32> to vector<64x32xf32>
    %93 = vector.shape_cast %90 : vector<64x32xf32> to vector<1x64x32xf32>
    tpu.vector_store %arg8[%c0_29, %c0_30, %c0_31], %93 {strides = array<i32>} : memref<1x64x32xf32, #tpu.memory_space<vmem>>, vector<1x64x32xf32>,
    return
  }
  func.func @transform_0(%arg0: i32) -> (i32, i32, i32) {
    %c0_i32 = arith.constant 0 : i32
    %c0_i32_0 = arith.constant 0 : i32
    %c0_i32_1 = arith.constant 0 : i32
    return %arg0, %c0_i32, %c0_i32_0 : i32, i32, i32
  }
  func.func @transform_1(%arg0: i32) -> (i32, i32) {
    %c0_i32 = arith.constant 0 : i32
    %c0_i32_0 = arith.constant 0 : i32
    %c0_i32_1 = arith.constant 0 : i32
    return %c0_i32, %c0_i32_0 : i32, i32
  }
  func.func @transform_2(%arg0: i32) -> (i32, i32) {
    %c0_i32 = arith.constant 0 : i32
    %c0_i32_0 = arith.constant 0 : i32
    %c0_i32_1 = arith.constant 0 : i32
    return %c0_i32, %c0_i32_0 : i32, i32
  }
  func.func @transform_3(%arg0: i32) -> (i32, i32, i32) {
    %c0_i32 = arith.constant 0 : i32
    %c0_i32_0 = arith.constant 0 : i32
    %c0_i32_1 = arith.constant 0 : i32
    %c0_i32_2 = arith.constant 0 : i32
    return %c0_i32, %c0_i32_0, %c0_i32_1 : i32, i32, i32
  }
  func.func @transform_4(%arg0: i32) -> (i32, i32, i32) {
    %c0_i32 = arith.constant 0 : i32
    %c0_i32_0 = arith.constant 0 : i32
    %c0_i32_1 = arith.constant 0 : i32
    %c0_i32_2 = arith.constant 0 : i32
    return %c0_i32, %c0_i32_0, %c0_i32_1 : i32, i32, i32
  }
  func.func @transform_5(%arg0: i32) -> (i32, i32) {
    %c0_i32 = arith.constant 0 : i32
    %c0_i32_0 = arith.constant 0 : i32
    %c0_i32_1 = arith.constant 0 : i32
    return %c0_i32, %c0_i32_0 : i32, i32
  }
  func.func @transform_6(%arg0: i32) -> (i32, i32) {
    %c0_i32 = arith.constant 0 : i32
    %c0_i32_0 = arith.constant 0 : i32
    %c0_i32_1 = arith.constant 0 : i32
    return %c0_i32, %c0_i32_0 : i32, i32
  }
  func.func @transform_7(%arg0: i32) -> (i32, i32, i32) {
    %c0_i32 = arith.constant 0 : i32
    %c0_i32_0 = arith.constant 0 : i32
    %c0_i32_1 = arith.constant 0 : i32
    return %arg0, %c0_i32, %c0_i32_0 : i32, i32, i32
  }
}

</mosaic_0001>

<bundles_post_ra>
// kernel: _lambda_.1
= control target key start
LH: loop header
LB: loop body
LE: loop exit
PB: predicated region body
PF: predicated region fallthrough
CT: control target
= control target key end

     0   :  { %12 = vsyncpa [#allocation4], 0  ;;  %s2389_s0 = inlined_call_operand.hbm [shape: f32[2,64,32], index: 0, kind: input, shape index: {}]   ;;  %s2390_s1 = inlined_call_operand.hbm [shape: f32[32,8], index: 1, kind: input, shape index: {}]   ;;  %s2391_s2 = inlined_call_operand.hbm [shape: f32[1,8], index: 2, kind: input, shape index: {}]   ;;  %s2392_s3 = inlined_call_operand.vmem [shape: f32[3,3,8], index: 3, kind: input, shape index: {}]   ;;  %s2393_s4 = inlined_call_operand.vmem [shape: f32[1,1,8], index: 4, kind: input, shape index: {}]   ;;  %s2394_s5 = inlined_call_operand.vmem [shape: f32[8,32], index: 5, kind: input, shape index: {}]   ;;  %s2395_s6 = inlined_call_operand.vmem [shape: f32[1,32], index: 6, kind: input, shape index: {}]   ;;  %s2396_s7 = inlined_call_operand.hbm [shape: f32[2,64,32], index: 7, kind: output, shape index: {}]  }
   0x1   :  { %14 = vsyncpa [#allocation4 + $0x1], 0 }
   0x2   :  { %15 = vsyncpa [#allocation7], 0 }
   0x3   :  { %16 = vsyncpa [#allocation5], 0 }
   0x4   :  { %18 = vsyncpa [#allocation5 + $0x1], 0  ;;  %s1716_s24 = smov 0   ;;  %s1718_s25 = smov 0  }
   0x5   :  { %s1720_s26 = smov 0   ;;  %s1722_s27 = smov 0  }
   0x6 LB: > { %s1737_s28 = sadd.s32 4294967295, %s1665_s27   ;;  %s1335_s29 = sadd.s32 4294967294, %s1665_s27   ;;  %s1665_s27 = sphi %s1722_s27, %s2418_s27   ;;  %s1661_s26 = sphi %s1720_s26, %s2417_s26   ;;  %s1657_s25 = sphi %s1718_s25, %s2416_s25   ;;  %s1653_s24 = sphi %s1716_s24, %s2415_s24  }
   0x7   : > { %p44_p0 = scmp.ne.s32.totalorder %s1657_s25, %s1653_s24  ;;  %p2397_p1 = scmp.eq.s32.totalorder %s1737_s28, 0 }
   0x8   : > { %p200_p3 = scmp.eq.s32.totalorder %s1335_s29, 1  ;;  %p1336_p5 = scmp.ge.s32.totalorder %s1665_s27, 1 }
   0x9   : > { %p1746_p4 = por %p2397_p1, %p44_p0  ;;  %p207_p7 = scmp.lt.s32.totalorder %s1665_s27, 3 }
   0xa   : > { %p1751_p6 = por %p200_p3, %p44_p0  ;;  %s1667_s10 = smov [#allocation6]  }
   0xb   : > { %s2401_s30 = scalar_select %p1746_p4, 1, 0 }
   0xc   : > { %s2402_s8 = scalar_select %p1751_p6, 1, 0 }
   0xd   : > { %p1756_p8 = pnand %p1336_p5, %p207_p7  ;;  %s219_s11 = sshll.u32 %s1667_s10, 4  ;;  %s1760_s11 = int_to_ptr.vmem [resolvable:$true] %s219_s11 }
   0xe   : > { %s1668_s13 = smov [#allocation8]   ;;  %s1509_s17 = scalar_lea.hbm %s2390_s1, 512 }
   0xf   : > { %p1449_p9 = pneg %p1756_p8  ;;  %s233_s14 = sshll.u32 %s1668_s13, 4  ;;  %s1771_s14 = int_to_ptr.vmem [resolvable:$true] %s233_s14 }
  0x10   : > { %p1510_p12 = scmp.ne.s32.totalorder %s2390_s1, %s1509_s17  ;;  %p1516_p5 = scmp.lt.u32.totalorder %s1509_s17, %s2390_s1 }
  0x11   : > { %p1767_p11 = pnand %p1449_p9, %p2397_p1 }
  0x13   : > { %p1511_p13 = pneg %p1767_p11 }
  0x15   : > { %p1512_p0 = pnand %p1511_p13, %p1510_p12 }
  0x17   : > { %p1513_p3 = pneg %p1512_p0 }
  0x19   : > { %p1518_p7 = pnand %p1516_p5, %p1513_p3 }
  0x1b   : > { %1521 = shalt.err (!%p1518_p7)
}
  0x1c   : > { %s1522_s22 = scalar_lea.vmem %s1760_s11, 512  ;;  %p1530_p2 = scmp.lt.s32.totalorder %s1760_s11, %s1760_s11 }
  0x1d   : > { %p1523_p9 = scmp.ne.s32.totalorder %s1760_s11, %s1522_s22  ;;  %p1531_p12 = scmp.lt.s32.totalorder %s1522_s22, %s1522_s22 }
  0x1f   : > { %p1525_p10 = pnand %p1523_p9, %p1511_p13  ;;  %p1532_p0 = por %p1531_p12, %p1530_p2 }
  0x21   : > { %p1526_p1 = pneg %p1525_p10 }
  0x23   : > { %p1533_p6 = pnand %p1532_p0, %p1526_p1 }
  0x25   : > { %1536 = shalt.err (!%p1533_p6)
}
  0x26   : > { %s2398_s23 = smov 128   ;;  %s1670_s29 = smov 8  }
  0x27   : > { %1452 = dma.hbm_to_vmem [thread:$0]  (!%p1767_p11), %s2390_s1, 512, %s1760_s11, [#allocation7], %s2398_s23, %s2398_s23, %s1670_s29  }
  0x28   : > { %s1537_s17 = scalar_lea.hbm %s2391_s2, 16 }
  0x29   : > { %p1538_p1 = scmp.ne.s32.totalorder %s2391_s2, %s1537_s17  ;;  %p1544_p10 = scmp.lt.u32.totalorder %s1537_s17, %s2391_s2 }
  0x2b   : > { %p1540_p2 = pnand %p1538_p1, %p1511_p13 }
  0x2d   : > { %p1541_p6 = pneg %p1540_p2 }
  0x2f   : > { %p1546_p3 = pnand %p1544_p10, %p1541_p6 }
  0x31   : > { %1549 = shalt.err (!%p1546_p3)
}
  0x32   : > { %s1550_s11 = scalar_lea.vmem %s1771_s14, 16  ;;  %s1557_s22 = scalar_lea.vmem %s1771_s14, 32 }
  0x33   : > { %p1551_p5 = scmp.ne.s32.totalorder %s1771_s14, %s1550_s11  ;;  %p1558_p12 = scmp.lt.s32.totalorder %s1771_s14, %s1771_s14 }
  0x34   : > { %p1559_p0 = scmp.lt.s32.totalorder %s1557_s22, %s1550_s11 }
  0x35   : > { %p1553_p7 = pnand %p1551_p5, %p1511_p13 }
  0x36   : > { %p1560_p1 = por %p1559_p0, %p1558_p12 }
  0x37   : > { %p1554_p9 = pneg %p1553_p7 }
  0x39   : > { %p1561_p2 = pnand %p1560_p1, %p1554_p9 }
  0x3b   : > { %1564 = shalt.err (!%p1561_p2)
}
  0x3c   : > { %1455 = dma.hbm_to_vmem [thread:$0]  (!%p1767_p11), %s2391_s2, 16, %s1771_s14, [#allocation7]  }
  0x3d   : > { %s1830_s15 = sadd.s32 1, %s1665_s27   ;;  %s31_s12 = sadd.s32 1, %s1661_s26 }
  0x3e   : > { %s28_s16 = ssub.s32 %s1665_s27, %s1830_s15  ;;  %p38_p13 = scmp.ne.s32.totalorder %s1661_s26, %s1657_s25 }
  0x3f   : > { %p29_p6 = scmp.eq.s32.totalorder %s28_s16, 0  ;;  %p39_p10 = scmp.eq.s32.totalorder %s1665_s27, 0 }
  0x40   : > { %p2405_p3 = scmp.eq.s32.totalorder %s1737_s28, 1  ;;  %p1466_p7 = scmp.lt.s32.totalorder %s1665_s27, 2 }
  0x41   : > { %s1846_s18 = scalar_select %p29_p6, %s1661_s26, %s31_s12  }
  0x42   : > { %p1840_p5 = por %p2405_p3, %p38_p13  ;;  %p40_p9 = por %p39_p10, %p38_p13 }
  0x43   : > { %s256_s19 = sand.u32 1, %s1661_s26   ;;  %s1372_s14 = sshll.u32 %s1665_s27, 10 }
  0x44   : > { %s2406_s17 = scalar_select %p1840_p5, 1, 0 }
  0x45   : > { %s1340_s20 = sshll.u32 %s256_s19, 6  ;;  %s1853_s22 = scalar_lea.hbm %s2389_s0, %s1372_s14 }
  0x46   : > { %s260_s10 = scalar_lea.vmem [#allocation3], %s1340_s20  ;;  %p1857_p11 = pnand %p1466_p7, %p40_p9 }
  0x47   : > { %s267_s13 = sshll.u32 %s260_s10, 4  ;;  %s1861_s16 = scalar_lea.sflag [#allocation4], %s256_s19  ;;  %s1855_s13 = int_to_ptr.vmem [resolvable:$true] %s267_s13 }
  0x48   : > { %s1565_s23 = scalar_lea.hbm %s1853_s22, 1024  ;;  %p1567_p0 = pneg %p1857_p11 }
  0x49   : > { %p1566_p12 = scmp.ne.s32.totalorder %s1853_s22, %s1565_s23  ;;  %s1570_s21 = scalar_lea.hbm %s2389_s0, 2048 }
  0x4a   : > { %p1571_p13 = scmp.lt.u32.totalorder %s1853_s22, %s2389_s0  ;;  %p1572_p6 = scmp.lt.u32.totalorder %s1570_s21, %s1565_s23 }
  0x4b   : > { %p1568_p1 = pnand %p1567_p0, %p1566_p12  ;;  %p1574_p3 = scmp.lt.u32.totalorder %s1565_s23, %s1853_s22 }
  0x4c   : > { %p1573_p10 = por %p1572_p6, %p1571_p13 }
  0x4d   : > { %p1569_p2 = pneg %p1568_p1 }
  0x4e   : > { %p1575_p7 = por %p1574_p3, %p1573_p10 }
  0x50   : > { %p1576_p9 = pnand %p1575_p7, %p1569_p2 }
  0x52   : > { %1579 = shalt.err (!%p1576_p9)
}
  0x53   : > { %s1580_s19 = scalar_lea.vmem %s1855_s13, 1024  ;;  %s1671_s20 = smov [#allocation3]  }
  0x54   : > { %p1581_p12 = scmp.ne.s32.totalorder %s1855_s13, %s1580_s19  ;;  %s1585_s14 = sshll.u32 %s1671_s20, 4  ;;  %s1586_s14 = int_to_ptr.vmem [resolvable:$false] %s1585_s14 }
  0x55   : > { %s1587_s11 = scalar_lea.vmem %s1586_s14, 2048  ;;  %p1588_p4 = scmp.lt.s32.totalorder %s1855_s13, %s1586_s14 }
  0x56   : > { %p1583_p1 = pnand %p1581_p12, %p1567_p0  ;;  %p1589_p13 = scmp.lt.s32.totalorder %s1587_s11, %s1580_s19 }
  0x58   : > { %p1584_p5 = pneg %p1583_p1  ;;  %p1590_p6 = por %p1589_p13, %p1588_p4 }
  0x5a   : > { %p1591_p10 = pnand %p1590_p6, %p1584_p5 }
  0x5c   : > { %1594 = shalt.err (!%p1591_p10)
}
  0x5d   : > { %s2408_s23 = smov 128   ;;  %279 = sbr.rel (%p1756_p8) target bundleno = 665 (0x299), region = 48 }
  0x5e   : > { %1459 = dma.hbm_to_vmem [thread:$0]  (!%p1857_p11), %s1853_s22, 1024, %s1855_s13, %s1861_s16, %s2408_s23, %s2408_s23, %s1670_s29  }
  0x5f   : > { %s1895_s21 = sand.u32 (!%p1756_p8), 1, %s1657_s25   ;;  %p2409_p4 = scmp.ne.s32.totalorder (!%p1756_p8), %s2401_s30, 0 }
  0x60   : > { %s1344_s10 = sshll.u32 (!%p1756_p8), %s1895_s21, 6  ;;  %s282_s19 = scalar_lea.sflag (!%p1756_p8), [#allocation4], %s1895_s21 }
  0x61   : > { %s285_s12 = scalar_lea.vmem (!%p1756_p8), [#allocation3], %s1344_s10 }
  0x64   : > { %1640 = dma.done.wait (%p2409_p4), %s282_s19, 1024  }
  0x65   : > { %1642 = vsyncadd (%p2409_p4), %s282_s19, 4294966272  ;;  %p2410_p5 = scmp.eq.s32.totalorder %s1737_s28, 0 }
  0x67   : > { %1644 = dma.done.wait (%p2410_p5), [#allocation7], 528   ;;  %p2411_p8 = pmov %p2410_p5 }
  0x68   : > { %vm343_vm0 = vcmask 261120   ;;  %v332_v0 = vld [vmem:[#allocation6] sm:$0xff]  ;;  %v333_v1 = vld [vmem:[#allocation6 + $0x8] sm:$0xff]  ;;  %v334_v2 = vld [vmem:[#allocation6 + $0x10] sm:$0xff]  ;;  %vm481_vm1 = vcmask 64512   ;;  %vm483_vm2 = vcmask 58368   ;;  %v535_v16 = vlaneseq }
  0x69   : > { %1646 = vsyncadd (%p2411_p8), [#allocation7], 4294966768  ;;  %v1429_v3 = vpack.c.bf16 %v333_v1, %v332_v0  ;;  %v335_v4 = vld [vmem:[#allocation6 + $0x18] sm:$0xff]  ;;  %v1909_v5 = vld [vmem:[%s285_s12] sm:$0xff]  ;;  %v1672_v14 = vmov 0.0   ;;  %vm591_vm3 = vcmask 1046528  }
  0x6a   : > { %v1433_v6 = vpack.c.bf16 %v335_v4, %v334_v2  ;;  %1403 = vmatprep.mubr.msk.f32.mxu0 %vm343_vm0, %v1909_v5  ;;  %v1913_v7 = vld [vmem:[%s285_s12 + $0x8] sm:$0xff]  ;;  %v1915_v8 = vld [vmem:[%s285_s12 + $0x10] sm:$0xff]  ;;  %v1921_v9 = vld [vmem:[%s285_s12 + $0x18] sm:$0xff]  ;;  %487 = vst.msk [vmem:[#allocation2 + $0x20] sm:$0xff] %vm481_vm1, %v1672_v14  ;;  %v536_v17 = vshrl.u32 %v535_v16, 7  ;;  %vm668_vm4 = vcmask 1045504  }
  0x6b   : > { %1430 = vmatprep.subr.bf16.mxu0 %v1429_v3  ;;  %v1923_v10 = vld [vmem:[%s285_s12 + $0x20] sm:$0xff]  ;;  %v1929_v11 = vld [vmem:[%s285_s12 + $0x28] sm:$0xff]  ;;  %v1931_v12 = vld [vmem:[%s285_s12 + $0x30] sm:$0xff]  ;;  %488 = vst.msk [vmem:[#allocation2 + $0x28] sm:$0x3] %vm483_vm2, %v1672_v14  ;;  %s2314_s30 = scalar_lea.vmem [#allocation9], %s1344_s10 }
  0x6c   : > { %1432 = vmatpush3.bf16.msra.mxu0 %v1429_v3  ;;  %v1937_v13 = vld [vmem:[%s285_s12 + $0x38] sm:$0xff]  ;;  %482 = vst.msk [vmem:[#allocation2] sm:$0xff] %vm481_vm1, %v1672_v14  ;;  %485 = vst.msk [vmem:[#allocation2 + $0x10] sm:$0xff] %vm481_vm1, %v1672_v14  ;;  %v1068_v15 = vld [vmem:[%s2394_s5] sm:$0xff]  ;;  %v557_v18 = vsub.s32 1, %v536_v17  ;;  %v634_v22 = vsub.s32 2, %v536_v17 }
  0x6d   : > { %1434 = vmatprep.subr.bf16.mxu0 %v1433_v6  ;;  %484 = vst.msk [vmem:[#allocation2 + $0x8] sm:$0x3] %vm483_vm2, %v1672_v14  ;;  %486 = vst.msk [vmem:[#allocation2 + $0x18] sm:$0x3] %vm483_vm2, %v1672_v14  ;;  %1415 = vmatprep.subr.mxu1 %v1068_v15  ;;  %v532_v19 = vld [vmem:[%s2392_s3] sm:$0x7] }
  0x6e   : > { %489 = vst.msk [vmem:[#allocation2 + $0x30] sm:$0xff] %vm481_vm1, %v1672_v14  ;;  %491 = vst.msk [vmem:[#allocation2 + $0x40] sm:$0xff] %vm481_vm1, %v1672_v14  ;;  %1416 = vmatpush3.msra.mxu1 %v1068_v15  ;;  %v1967_v20 = vrot.slane %v532_v19, %v557_v18  ;;  %v537_v24 = vsub.s32 0, %v536_v17  ;;  %v1971_v27 = vrot.slane %v532_v19, %v634_v22  ;;  %v1348_v28 = vld [vmem:[#allocation8] ss:$0 sm:$0xff]  ;;  %s1373_s10 = sshll.u32 %s1737_s28, 10 }
  0x6f   : > { %490 = vst.msk [vmem:[#allocation2 + $0x38] sm:$0x3] %vm483_vm2, %v1672_v14  ;;  %492 = vst.msk [vmem:[#allocation2 + $0x48] sm:$0x3] %vm483_vm2, %v1672_v14  ;;  %v533_v49 = vld [vmem:[%s2392_s3 + $0x4] sm:$0x7]  ;;  %s2339_s13 = scalar_lea.hbm %s2396_s7, %s1373_s10 }
  0x70   : > { %1436 = vmatpush3.bf16.msra.mxu0 %v1433_v6  ;;  %493 = vst.msk [vmem:[#allocation2 + $0x50] sm:$0xff] %vm481_vm1, %v1672_v14  ;;  %495 = vst.msk [vmem:[#allocation2 + $0x60] sm:$0xff] %vm481_vm1, %v1672_v14  ;;  %v1973_v30 = vrot.slane %v532_v19, %v537_v24  ;;  %v534_v50 = vld [vmem:[%s2392_s3 + $0x8] sm:$0x7]  ;;  %v1990_v58 = vrot.slane %v533_v49, %v537_v24  ;;  %v1994_v61 = vrot.slane %v533_v49, %v557_v18  ;;  %s1243_s9 = sshll.u32 %s2314_s30, 4  ;;  %s1230_s28 = scalar_lea.sflag [#allocation5], %s1895_s21  ;;  %s2341_s9 = int_to_ptr.vmem [resolvable:$true] %s1243_s9 }
  0x71   : > { %494 = vst.msk [vmem:[#allocation2 + $0x58] sm:$0x3] %vm483_vm2, %v1672_v14  ;;  %496 = vst.msk [vmem:[#allocation2 + $0x68] sm:$0x3] %vm483_vm2, %v1672_v14  ;;  %v1992_v59 = vrot.slane %v534_v50, %v537_v24  ;;  %v1996_v62 = vrot.slane %v534_v50, %v557_v18  ;;  %v2007_v17 = vrot.slane %v533_v49, %v634_v22  ;;  %s1595_s16 = scalar_lea.vmem %s2341_s9, 1024  ;;  %p2412_p0 = scmp.ne.s32.totalorder %s2406_s17, 0 }
  0x72   : > { %497 = vst.msk [vmem:[#allocation2 + $0x70] sm:$0xff] %vm481_vm1, %v1672_v14  ;;  %499 = vst.msk [vmem:[#allocation2 + $0x80] sm:$0xff] %vm481_vm1, %v1672_v14  ;;  %v2009_v18 = vrot.slane %v534_v50, %v634_v22  ;;  %p1596_p11 = scmp.ne.s32.totalorder %s2341_s9, %s1595_s16  ;;  %s1673_s20 = smov [#allocation9]  }
  0x73   : > { %1404 = vmatmul.mubr.msk.f32.vlgmr.msra.gmra.mrb[0].mxu0 %vm343_vm0, %v1913_v7  ;;  %498 = vst.msk [vmem:[#allocation2 + $0x78] sm:$0x3] %vm483_vm2, %v1672_v14  ;;  %500 = vst.msk [vmem:[#allocation2 + $0x88] sm:$0x3] %vm483_vm2, %v1672_v14  ;;  %v512_v21 = vld [vmem:[#allocation2] sm:$0xff]  ;;  %s1599_s14 = sshll.u32 %s1673_s20, 4  ;;  %s1600_s14 = int_to_ptr.vmem [resolvable:$false] %s1599_s14 }
  0x74   : > { %1406 = vmatprep.mubr.msk.f32.mxu0 %vm343_vm0, %v1915_v8  ;;  %501 = vst.msk [vmem:[#allocation2 + $0x90] sm:$0xff] %vm481_vm1, %v1672_v14  ;;  %v513_v23 = vld [vmem:[#allocation2 + $0x8] sm:$0x3]  ;;  %v559_v25 = vmul.f32 %v1967_v20, %v512_v21  ;;  %v636_v35 = vmul.f32 %v1971_v27, %v512_v21  ;;  %v539_v41 = vmul.f32 %v1973_v30, %v512_v21  ;;  %p1597_p2 = pnand %p1596_p11, %p2412_p0  ;;  %s1601_s11 = scalar_lea.vmem %s1600_s14, 2048 }
  0x75   : > { %502 = vst.msk [vmem:[#allocation2 + $0x98] sm:$0x3] %vm483_vm2, %v1672_v14  ;;  %v560_v26 = vmul.f32 %v1967_v20, %v513_v23  ;;  %v637_v36 = vmul.f32 %v1971_v27, %v513_v23  ;;  %p1602_p7 = scmp.lt.s32.totalorder %s2341_s9, %s1600_s14  ;;  %p1603_p9 = scmp.lt.s32.totalorder %s1601_s11, %s1595_s16 }
  0x76   : > { %v592_v31 = vrot.slane %v559_v25, 1  ;;  %v669_v45 = vrot.slane %v636_v35, 2  ;;  %p1598_p3 = pneg %p1597_p2 }
  0x77   : > { %1407 = vmatmul.mubr.msk.f32.gmra.mrb[2].mxu0 %vm343_vm0, %v1921_v9  ;;  %v593_v34 = vrot.slane %v560_v26, 1  ;;  %v670_v46 = vrot.slane %v637_v36, 2  ;;  %p1604_p12 = por %p1603_p9, %p1602_p7 }
  0x78   : > { %1409 = vmatprep.mubr.msk.f32.mxu0 %vm343_vm0, %v1923_v10 }
  0x79   : > { %v594_v44 = vsel %vm591_vm3, %v592_v31, %v593_v34  ;;  %v671_v56 = vsel %vm668_vm4, %v669_v45, %v670_v46  ;;  %p1605_p1 = pnand %p1604_p12, %p1598_p3 }
  0x7a   : > { %v624_v53 = vadd.f32 %v594_v44, %v539_v41 }
  0x7b   : > { %1410 = vmatmul.mubr.msk.f32.gmra.mrb[4].mxu0 %vm343_vm0, %v1929_v11 }
  0x7c   : > { %1412 = vmatprep.mubr.msk.f32.mxu0 %vm343_vm0, %v1931_v12  ;;  %v701_v3 = vadd.f32 %v671_v56, %v624_v53 }
  0x7f   : > { %1413 = vmatmul.mubr.msk.f32.gmra.mrb[6].mxu0 %vm343_vm0, %v1937_v13 }
 0x146   : > { %v1405_v29 = vpop.f32.mrb[0].mxu0 }
 0x147   : > { %v440_v32 = vadd.f32 %v1405_v29, %v1348_v28  ;;  %v434_v33 = vpop.f32.mrb[1].mxu0 }
 0x148   : > { %v435_v37 = vadd.f32 %v1348_v28, %v434_v33 }
 0x149   : > { %v474_v38 = vmax.f32 %v440_v32, 0.0 }
 0x14a   : > { %v473_v39 = vmax.f32 %v435_v37, 0.0  ;;  %v1408_v40 = vpop.f32.mrb[2].mxu0 }
 0x14b   : > { %505 = vst.msk [vmem:[#allocation2 + $0x21] sm:$0xff] %vm481_vm1, %v474_v38  ;;  %v450_v42 = vadd.f32 %v1408_v40, %v1348_v28  ;;  %v444_v43 = vpop.f32.mrb[3].mxu0 }
 0x14c   : > { %504 = vst.msk [vmem:[#allocation2 + $0x11] sm:$0xff] %vm481_vm1, %v473_v39  ;;  %v445_v47 = vadd.f32 %v1348_v28, %v444_v43 }
 0x14d   : > { %v476_v48 = vmax.f32 %v450_v42, 0.0 }
 0x14e   : > { %v475_v51 = vmax.f32 %v445_v47, 0.0  ;;  %v1411_v52 = vpop.f32.mrb[4].mxu0 }
 0x14f   : > { %507 = vst.msk [vmem:[#allocation2 + $0x41] sm:$0xff] %vm481_vm1, %v476_v48  ;;  %v460_v54 = vadd.f32 %v1411_v52, %v1348_v28  ;;  %v454_v55 = vpop.f32.mrb[5].mxu0 }
 0x150   : > { %506 = vst.msk [vmem:[#allocation2 + $0x31] sm:$0xff] %vm481_vm1, %v475_v51  ;;  %v455_v57 = vadd.f32 %v1348_v28, %v454_v55 }
 0x151   : > { %v478_v60 = vmax.f32 %v460_v54, 0.0 }
 0x152   : > { %v477_v63 = vmax.f32 %v455_v57, 0.0  ;;  %v1414_v0 = vpop.f32.mrb[6].mxu0  ;;  %v1998_v1 = vld [vmem:[#allocation2 + $0x20] sm:$0xff]  ;;  %v2000_v2 = vld [vmem:[#allocation2 + $0x28] sm:$0x3] }
 0x153   : > { %509 = vst.msk [vmem:[#allocation2 + $0x61] sm:$0xff] %vm481_vm1, %v478_v60  ;;  %v470_v4 = vadd.f32 %v1414_v0, %v1348_v28  ;;  %v464_v6 = vpop.f32.mrb[7].mxu0  ;;  %v514_v14 = vld [vmem:[#allocation2 + $0x10] sm:$0xff]  ;;  %v515_v15 = vld [vmem:[#allocation2 + $0x18] sm:$0x3]  ;;  %v2005_v16 = vmul.f32 %v1967_v20, %v2000_v2  ;;  %v885_v24 = vmul.f32 %v1992_v59, %v1998_v1  ;;  %v905_v31 = vmul.f32 %v1996_v62, %v1998_v1 }
 0x154   : > { %508 = vst.msk [vmem:[#allocation2 + $0x51] sm:$0xff] %vm481_vm1, %v477_v63  ;;  %v465_v19 = vadd.f32 %v1348_v28, %v464_v6  ;;  %v562_v21 = vmul.f32 %v1967_v20, %v515_v15  ;;  %v713_v23 = vmul.f32 %v1990_v58, %v514_v14  ;;  %v733_v26 = vmul.f32 %v1994_v61, %v514_v14 }
 0x155   : > { %v480_v25 = vmax.f32 %v470_v4, 0.0  ;;  %v734_v29 = vmul.f32 %v1994_v61, %v515_v15  ;;  %v599_v32 = vrot.slane %v2005_v16, 1  ;;  %v639_v28 = vmul.f32 %v1971_v27, %v515_v15 }
 0x156   : > { %v479_v22 = vmax.f32 %v465_v19, 0.0  ;;  %v721_v33 = vadd.f32 %v713_v23, %v701_v3  ;;  %v765_v34 = vrot.slane %v733_v26, 1  ;;  %v809_v36 = vmul.f32 %v2007_v17, %v514_v14 }
 0x157   : > { %511 = vst.msk [vmem:[#allocation2 + $0x81] sm:$0xff] %vm481_vm1, %v480_v25  ;;  %v766_v35 = vrot.slane %v734_v29, 1  ;;  %v810_v37 = vmul.f32 %v2007_v17, %v515_v15  ;;  %v596_v38 = vrot.slane %v562_v21, 1  ;;  %v906_v39 = vmul.f32 %v1996_v62, %v2000_v2  ;;  %v2041_v60 = vld [vmem:[#allocation2 + $0x30] sm:$0xff]  ;;  %v2049_v19 = vld [vmem:[#allocation2 + $0x38] sm:$0x3] }
 0x158   : > { %510 = vst.msk [vmem:[#allocation2 + $0x71] sm:$0xff] %vm481_vm1, %v479_v22  ;;  %v981_v40 = vmul.f32 %v2009_v18, %v1998_v1  ;;  %v982_v41 = vmul.f32 %v2009_v18, %v2000_v2  ;;  %v841_v43 = vrot.slane %v809_v36, 2  ;;  %v937_v45 = vrot.slane %v905_v31, 1 }
 0x159   : > { %v767_v42 = vsel %vm591_vm3, %v765_v34, %v766_v35  ;;  %v842_v44 = vrot.slane %v810_v37, 2  ;;  %v938_v47 = vrot.slane %v906_v39, 1  ;;  %v673_v50 = vrot.slane %v639_v28, 2 }
 0x15a   : > { %v797_v46 = vadd.f32 %v767_v42, %v721_v33  ;;  %v1013_v48 = vrot.slane %v981_v40, 2  ;;  %v1014_v49 = vrot.slane %v982_v41, 2  ;;  %v561_v52 = vmul.f32 %v1967_v20, %v514_v14  ;;  %v2060_v33 = vld [vmem:[%s2393_s4] ss:$0 sm:$0xff] }
 0x15b   : > { %v843_v51 = vsel %vm668_vm4, %v841_v43, %v842_v44  ;;  %v638_v53 = vmul.f32 %v1971_v27, %v514_v14  ;;  %v540_v55 = vmul.f32 %v1973_v30, %v514_v14  ;;  %v714_v56 = vmul.f32 %v1990_v58, %v1998_v1 }
 0x15c   : > { %v873_v54 = vadd.f32 %v843_v51, %v797_v46  ;;  %v735_v57 = vmul.f32 %v1994_v61, %v1998_v1  ;;  %v595_v63 = vrot.slane %v561_v52, 1  ;;  %v736_v3 = vmul.f32 %v1994_v61, %v2000_v2 }
 0x15d   : > { %v672_v0 = vrot.slane %v638_v53, 2  ;;  %v811_v4 = vmul.f32 %v2007_v17, %v1998_v1  ;;  %v939_v15 = vsel %vm591_vm3, %v937_v45, %v938_v47  ;;  %v1015_v14 = vsel %vm668_vm4, %v1013_v48, %v1014_v49 }
 0x15e   : > { %v893_v6 = vadd.f32 %v885_v24, %v873_v54  ;;  %v812_v21 = vmul.f32 %v2007_v17, %v2000_v2  ;;  %v597_v23 = vsel %vm591_vm3, %v595_v63, %v596_v38  ;;  %v768_v26 = vrot.slane %v735_v57, 1  ;;  %v2085_v63 = vld [vmem:[#allocation2 + $0x40] sm:$0xff] }
 0x15f   : > { %v674_v25 = vsel %vm668_vm4, %v672_v0, %v673_v50  ;;  %v769_v29 = vrot.slane %v736_v3, 1  ;;  %v625_v22 = vadd.f32 %v597_v23, %v540_v55  ;;  %v844_v28 = vrot.slane %v811_v4, 2  ;;  %v2087_v0 = vld [vmem:[#allocation2 + $0x48] sm:$0x3] }
 0x160   : > { %v969_v31 = vadd.f32 %v939_v15, %v893_v6  ;;  %v907_v24 = vmul.f32 %v1996_v62, %v2041_v60  ;;  %v845_v34 = vrot.slane %v812_v21, 2  ;;  %v908_v35 = vmul.f32 %v1996_v62, %v2049_v19 }
 0x161   : > { %v983_v36 = vmul.f32 %v2009_v18, %v2041_v60  ;;  %v984_v37 = vmul.f32 %v2009_v18, %v2049_v19  ;;  %v702_v39 = vadd.f32 %v674_v25, %v625_v22  ;;  %v886_v40 = vmul.f32 %v1992_v59, %v2041_v60 }
 0x162   : > { %v1045_v38 = vadd.f32 %v1015_v14, %v969_v31  ;;  %v940_v41 = vrot.slane %v907_v24, 1  ;;  %v770_v42 = vsel %vm591_vm3, %v768_v26, %v769_v29  ;;  %v941_v43 = vrot.slane %v908_v35, 1 }
 0x163   : > { %v1016_v44 = vrot.slane %v983_v36, 2  ;;  %v1017_v45 = vrot.slane %v984_v37, 2  ;;  %v722_v47 = vadd.f32 %v714_v56, %v702_v39  ;;  %v563_v48 = vmul.f32 %v1967_v20, %v1998_v1 }
 0x164   : > { %v1060_v46 = vadd.f32 %v2060_v33, %v1045_v38  ;;  %v640_v49 = vmul.f32 %v1971_v27, %v1998_v1  ;;  %v846_v50 = vsel %vm668_vm4, %v844_v28, %v845_v34  ;;  %v942_v51 = vsel %vm591_vm3, %v940_v41, %v941_v43 }
 0x165   : > { %v541_v52 = vmul.f32 %v1973_v30, %v1998_v1  ;;  %v641_v53 = vmul.f32 %v1971_v27, %v2000_v2  ;;  %v798_v54 = vadd.f32 %v770_v42, %v722_v47  ;;  %v598_v55 = vrot.slane %v563_v48, 1 }
 0x166   : > { %1417 = vmatprep.mubr.msk.f32.mxu1 %vm481_vm1, %v1060_v46  ;;  %v675_v56 = vrot.slane %v640_v49, 2  ;;  %v737_v57 = vmul.f32 %v1994_v61, %v2041_v60  ;;  %v738_v4 = vmul.f32 %v1994_v61, %v2049_v19  ;;  %v813_v1 = vmul.f32 %v2007_v17, %v2041_v60 }
 0x167   : > { %v676_v3 = vrot.slane %v641_v53, 2  ;;  %v814_v2 = vmul.f32 %v2007_v17, %v2049_v19  ;;  %v874_v6 = vadd.f32 %v846_v50, %v798_v54  ;;  %v1018_v15 = vsel %vm668_vm4, %v1016_v44, %v1017_v45 }
 0x168   : > { %v600_v14 = vsel %vm591_vm3, %v598_v55, %v599_v32  ;;  %v771_v21 = vrot.slane %v737_v57, 1  ;;  %v772_v26 = vrot.slane %v738_v4, 1  ;;  %v847_v29 = vrot.slane %v813_v1, 2  ;;  %v2129_v1 = vld [vmem:[#allocation2 + $0x50] sm:$0xff] }
 0x169   : > { %v626_v23 = vadd.f32 %v600_v14, %v541_v52  ;;  %v677_v25 = vsel %vm668_vm4, %v675_v56, %v676_v3  ;;  %v894_v31 = vadd.f32 %v886_v40, %v874_v6  ;;  %v848_v22 = vrot.slane %v814_v2, 2 }
 0x16a   : > { %v909_v28 = vmul.f32 %v1996_v62, %v2085_v63  ;;  %v910_v24 = vmul.f32 %v1996_v62, %v2087_v0  ;;  %v715_v16 = vmul.f32 %v1990_v58, %v2041_v60  ;;  %v985_v32 = vmul.f32 %v2009_v18, %v2085_v63 }
 0x16b   : > { %v703_v34 = vadd.f32 %v677_v25, %v626_v23  ;;  %v986_v35 = vmul.f32 %v2009_v18, %v2087_v0  ;;  %v970_v36 = vadd.f32 %v942_v51, %v894_v31  ;;  %v773_v37 = vsel %vm591_vm3, %v771_v21, %v772_v26 }
 0x16c   : > { %v943_v38 = vrot.slane %v909_v28, 1  ;;  %v944_v39 = vrot.slane %v910_v24, 1  ;;  %v849_v41 = vsel %vm668_vm4, %v847_v29, %v848_v22  ;;  %v887_v42 = vmul.f32 %v1992_v59, %v2085_v63 }
 0x16d   : > { %v723_v40 = vadd.f32 %v715_v16, %v703_v34  ;;  %v1019_v43 = vrot.slane %v985_v32, 2  ;;  %v1046_v44 = vadd.f32 %v1018_v15, %v970_v36  ;;  %v1020_v45 = vrot.slane %v986_v35, 2 }
 0x16e   : > { %v565_v46 = vmul.f32 %v1967_v20, %v2041_v60  ;;  %v566_v47 = vmul.f32 %v1967_v20, %v2049_v19  ;;  %v542_v49 = vmul.f32 %v1973_v30, %v2041_v60  ;;  %v642_v50 = vmul.f32 %v1971_v27, %v2041_v60  ;;  %v2131_v60 = vld [vmem:[#allocation2 + $0x58] sm:$0x3] }
 0x16f   : > { %v799_v48 = vadd.f32 %v773_v37, %v723_v40  ;;  %v643_v51 = vmul.f32 %v1971_v27, %v2049_v19  ;;  %v1061_v52 = vadd.f32 %v2060_v33, %v1046_v44  ;;  %v945_v53 = vsel %vm591_vm3, %v943_v38, %v944_v39 }
 0x170   : > { %v601_v54 = vrot.slane %v565_v46, 1  ;;  %v602_v55 = vrot.slane %v566_v47, 1  ;;  %v678_v57 = vrot.slane %v642_v50, 2  ;;  %v739_v4 = vmul.f32 %v1994_v61, %v2085_v63 }
 0x171   : > { %v875_v56 = vadd.f32 %v849_v41, %v799_v48  ;;  %v679_v3 = vrot.slane %v643_v51, 2  ;;  %1418 = vmatmul.mubr.msk.f32.vlgmr.msra.gmra.mrb[0].mxu1 %vm481_vm1, %v1061_v52  ;;  %v740_v2 = vmul.f32 %v1994_v61, %v2087_v0  ;;  %v815_v6 = vmul.f32 %v2007_v17, %v2085_v63 }
 0x172   : > { %v603_v19 = vsel %vm591_vm3, %v601_v54, %v602_v55  ;;  %v816_v15 = vmul.f32 %v2007_v17, %v2087_v0  ;;  %v716_v25 = vmul.f32 %v1990_v58, %v2085_v63  ;;  %v774_v26 = vrot.slane %v739_v4, 1 }
 0x173   : > { %v895_v14 = vadd.f32 %v887_v42, %v875_v56  ;;  %v627_v21 = vadd.f32 %v603_v19, %v542_v49  ;;  %v680_v23 = vsel %vm668_vm4, %v678_v57, %v679_v3  ;;  %v775_v29 = vrot.slane %v740_v2, 1  ;;  %v2171_v3 = vld [vmem:[#allocation2 + $0x60] sm:$0xff] }
 0x174   : > { %v850_v31 = vrot.slane %v815_v6, 2  ;;  %v851_v22 = vrot.slane %v816_v15, 2  ;;  %v911_v34 = vmul.f32 %v1996_v62, %v2129_v1  ;;  %v912_v16 = vmul.f32 %v1996_v62, %v2131_v60  ;;  %v2177_v6 = vld [vmem:[#allocation2 + $0x68] sm:$0x3] }
 0x175   : > { %v971_v28 = vadd.f32 %v945_v53, %v895_v14  ;;  %v704_v24 = vadd.f32 %v680_v23, %v627_v21  ;;  %v1021_v32 = vsel %vm668_vm4, %v1019_v43, %v1020_v45  ;;  %v888_v35 = vmul.f32 %v1992_v59, %v2129_v1 }
 0x176   : > { %v987_v36 = vmul.f32 %v2009_v18, %v2129_v1  ;;  %v988_v37 = vmul.f32 %v2009_v18, %v2131_v60  ;;  %v946_v40 = vrot.slane %v911_v34, 1  ;;  %v947_v41 = vrot.slane %v912_v16, 1 }
 0x177   : > { %v1047_v38 = vadd.f32 %v1021_v32, %v971_v28  ;;  %v724_v39 = vadd.f32 %v716_v25, %v704_v24  ;;  %v776_v42 = vsel %vm591_vm3, %v774_v26, %v775_v29  ;;  %v852_v44 = vsel %vm668_vm4, %v850_v31, %v851_v22 }
 0x178   : > { %v1022_v46 = vrot.slane %v987_v36, 2  ;;  %v567_v43 = vmul.f32 %v1967_v20, %v2085_v63  ;;  %v1023_v48 = vrot.slane %v988_v37, 2  ;;  %v568_v49 = vmul.f32 %v1967_v20, %v2087_v0 }
 0x179   : > { %v1062_v45 = vadd.f32 %v2060_v33, %v1047_v38  ;;  %v800_v47 = vadd.f32 %v776_v42, %v724_v39  ;;  %v543_v50 = vmul.f32 %v1973_v30, %v2085_v63  ;;  %v644_v52 = vmul.f32 %v1971_v27, %v2085_v63 }
 0x17a   : > { %v604_v51 = vrot.slane %v567_v43, 1  ;;  %v645_v53 = vmul.f32 %v1971_v27, %v2087_v0  ;;  %v948_v55 = vsel %vm591_vm3, %v946_v40, %v947_v41  ;;  %v605_v56 = vrot.slane %v568_v49, 1 }
 0x17b   : > { %1420 = vmatprep.mubr.msk.f32.mxu1 %vm481_vm1, %v1062_v45  ;;  %v876_v54 = vadd.f32 %v852_v44, %v800_v47  ;;  %v741_v57 = vmul.f32 %v1994_v61, %v2129_v1  ;;  %v681_v4 = vrot.slane %v644_v52, 2  ;;  %v742_v2 = vmul.f32 %v1994_v61, %v2131_v60 }
 0x17c   : > { %v682_v19 = vrot.slane %v645_v53, 2  ;;  %v817_v63 = vmul.f32 %v2007_v17, %v2129_v1  ;;  %v606_v15 = vsel %vm591_vm3, %v604_v51, %v605_v56  ;;  %v818_v21 = vmul.f32 %v2007_v17, %v2131_v60 }
 0x17d   : > { %v896_v0 = vadd.f32 %v888_v35, %v876_v54  ;;  %v777_v14 = vrot.slane %v741_v57, 1  ;;  %v1024_v23 = vsel %vm668_vm4, %v1022_v46, %v1023_v48  ;;  %v628_v25 = vadd.f32 %v606_v15, %v543_v50 }
 0x17e   : > { %v778_v26 = vrot.slane %v742_v2, 1  ;;  %v853_v29 = vrot.slane %v817_v63, 2  ;;  %v683_v22 = vsel %vm668_vm4, %v681_v4, %v682_v19  ;;  %v854_v28 = vrot.slane %v818_v21, 2  ;;  %v2213_v2 = vld [vmem:[#allocation2 + $0x70] sm:$0xff]  ;;  %v2215_v63 = vld [vmem:[#allocation2 + $0x78] sm:$0x3] }
 0x17f   : > { %v972_v31 = vadd.f32 %v948_v55, %v896_v0  ;;  %v913_v24 = vmul.f32 %v1996_v62, %v2171_v3  ;;  %v705_v34 = vadd.f32 %v683_v22, %v628_v25  ;;  %v717_v16 = vmul.f32 %v1990_v58, %v2129_v1 }
 0x180   : > { %v914_v32 = vmul.f32 %v1996_v62, %v2177_v6  ;;  %v989_v35 = vmul.f32 %v2009_v18, %v2171_v3  ;;  %v779_v37 = vsel %vm591_vm3, %v777_v14, %v778_v26  ;;  %v990_v39 = vmul.f32 %v2009_v18, %v2177_v6 }
 0x181   : > { %v1048_v36 = vadd.f32 %v1024_v23, %v972_v31  ;;  %v949_v38 = vrot.slane %v913_v24, 1  ;;  %v725_v40 = vadd.f32 %v717_v16, %v705_v34  ;;  %v855_v41 = vsel %vm668_vm4, %v853_v29, %v854_v28 }
 0x182   : > { %v889_v42 = vmul.f32 %v1992_v59, %v2171_v3  ;;  %v950_v44 = vrot.slane %v914_v32, 1  ;;  %v1025_v43 = vrot.slane %v989_v35, 2  ;;  %v569_v45 = vmul.f32 %v1967_v20, %v2129_v1 }
 0x183   : > { %v1063_v46 = vadd.f32 %v2060_v33, %v1048_v36  ;;  %v570_v47 = vmul.f32 %v1967_v20, %v2131_v60  ;;  %v801_v48 = vadd.f32 %v779_v37, %v725_v40  ;;  %v544_v49 = vmul.f32 %v1973_v30, %v2129_v1 }
 0x184   : > { %v646_v50 = vmul.f32 %v1971_v27, %v2129_v1  ;;  %v647_v51 = vmul.f32 %v1971_v27, %v2131_v60  ;;  %v951_v52 = vsel %vm591_vm3, %v949_v38, %v950_v44  ;;  %v1026_v53 = vrot.slane %v990_v39, 2 }
 0x185   : > { %1421 = vmatmul.mubr.msk.f32.gmra.mrb[2].mxu1 %vm481_vm1, %v1063_v46  ;;  %v607_v54 = vrot.slane %v569_v45, 1  ;;  %v608_v55 = vrot.slane %v570_v47, 1  ;;  %v877_v56 = vadd.f32 %v855_v41, %v801_v48  ;;  %v743_v19 = vmul.f32 %v1994_v61, %v2171_v3 }
 0x186   : > { %v684_v57 = vrot.slane %v646_v50, 2  ;;  %v685_v4 = vrot.slane %v647_v51, 2  ;;  %v744_v60 = vmul.f32 %v1994_v61, %v2177_v6  ;;  %v819_v0 = vmul.f32 %v2007_v17, %v2171_v3 }
 0x187   : > { %v609_v1 = vsel %vm591_vm3, %v607_v54, %v608_v55  ;;  %v820_v15 = vmul.f32 %v2007_v17, %v2177_v6  ;;  %v897_v14 = vadd.f32 %v889_v42, %v877_v56  ;;  %v718_v25 = vmul.f32 %v1990_v58, %v2171_v3 }
 0x188   : > { %v629_v21 = vadd.f32 %v609_v1, %v544_v49  ;;  %v686_v23 = vsel %vm668_vm4, %v684_v57, %v685_v4  ;;  %v780_v26 = vrot.slane %v743_v19, 1  ;;  %v781_v29 = vrot.slane %v744_v60, 1  ;;  %v528_v4 = vld [vmem:[#allocation2 + $0x80] sm:$0xff] }
 0x189   : > { %v856_v31 = vrot.slane %v819_v0, 2  ;;  %v857_v22 = vrot.slane %v820_v15, 2  ;;  %v973_v28 = vadd.f32 %v951_v52, %v897_v14  ;;  %v915_v34 = vmul.f32 %v1996_v62, %v2213_v2 }
 0x18a   : > { %v706_v24 = vadd.f32 %v686_v23, %v629_v21  ;;  %v916_v16 = vmul.f32 %v1996_v62, %v2215_v63  ;;  %v1027_v32 = vsel %vm668_vm4, %v1025_v43, %v1026_v53  ;;  %v890_v35 = vmul.f32 %v1992_v59, %v2213_v2 }
 0x18b   : > { %v991_v36 = vmul.f32 %v2009_v18, %v2213_v2  ;;  %v992_v37 = vmul.f32 %v2009_v18, %v2215_v63  ;;  %v1049_v38 = vadd.f32 %v1027_v32, %v973_v28  ;;  %v952_v40 = vrot.slane %v915_v34, 1 }
 0x18c   : > { %v726_v39 = vadd.f32 %v718_v25, %v706_v24  ;;  %v953_v41 = vrot.slane %v916_v16, 1  ;;  %v782_v42 = vsel %vm591_vm3, %v780_v26, %v781_v29  ;;  %v858_v44 = vsel %vm668_vm4, %v856_v31, %v857_v22 }
 0x18d   : > { %v1028_v46 = vrot.slane %v991_v36, 2  ;;  %v571_v43 = vmul.f32 %v1967_v20, %v2171_v3  ;;  %v1064_v45 = vadd.f32 %v2060_v33, %v1049_v38  ;;  %v1029_v48 = vrot.slane %v992_v37, 2 }
 0x18e   : > { %v802_v47 = vadd.f32 %v782_v42, %v726_v39  ;;  %v572_v49 = vmul.f32 %v1967_v20, %v2177_v6  ;;  %v545_v50 = vmul.f32 %v1973_v30, %v2171_v3  ;;  %v648_v52 = vmul.f32 %v1971_v27, %v2171_v3 }
 0x18f   : > { %v610_v51 = vrot.slane %v571_v43, 1  ;;  %v649_v53 = vmul.f32 %v1971_v27, %v2177_v6  ;;  %1423 = vmatprep.mubr.msk.f32.mxu1 %vm481_vm1, %v1064_v45  ;;  %v954_v55 = vsel %vm591_vm3, %v952_v40, %v953_v41  ;;  %v745_v57 = vmul.f32 %v1994_v61, %v2213_v2  ;;  %v529_v6 = vld [vmem:[#allocation2 + $0x88] sm:$0x3] }
 0x190   : > { %v878_v54 = vadd.f32 %v858_v44, %v802_v47  ;;  %v611_v56 = vrot.slane %v572_v49, 1  ;;  %v687_v19 = vrot.slane %v648_v52, 2  ;;  %v746_v60 = vmul.f32 %v1994_v61, %v2215_v63  ;;  %v530_v52 = vld [vmem:[#allocation2 + $0x90] sm:$0xff] }
 0x191   : > { %v688_v1 = vrot.slane %v649_v53, 2  ;;  %v821_v3 = vmul.f32 %v2007_v17, %v2213_v2  ;;  %v783_v14 = vrot.slane %v745_v57, 1  ;;  %v822_v21 = vmul.f32 %v2007_v17, %v2215_v63  ;;  %v531_v53 = vld [vmem:[#allocation2 + $0x98] sm:$0x3] }
 0x192   : > { %v898_v0 = vadd.f32 %v890_v35, %v878_v54  ;;  %v612_v15 = vsel %vm591_vm3, %v610_v51, %v611_v56  ;;  %v1030_v23 = vsel %vm668_vm4, %v1028_v46, %v1029_v48  ;;  %v784_v26 = vrot.slane %v746_v60, 1 }
 0x193   : > { %v630_v25 = vadd.f32 %v612_v15, %v545_v50  ;;  %v859_v29 = vrot.slane %v821_v3, 2  ;;  %v689_v22 = vsel %vm668_vm4, %v687_v19, %v688_v1  ;;  %v860_v28 = vrot.slane %v822_v21, 2 }
 0x194   : > { %v974_v31 = vadd.f32 %v954_v55, %v898_v0  ;;  %v917_v24 = vmul.f32 %v1996_v62, %v528_v4  ;;  %v719_v16 = vmul.f32 %v1990_v58, %v2213_v2  ;;  %v918_v32 = vmul.f32 %v1996_v62, %v529_v6 }
 0x195   : > { %v707_v34 = vadd.f32 %v689_v22, %v630_v25  ;;  %v993_v35 = vmul.f32 %v2009_v18, %v528_v4  ;;  %v785_v37 = vsel %vm591_vm3, %v783_v14, %v784_v26  ;;  %v994_v38 = vmul.f32 %v2009_v18, %v529_v6 }
 0x196   : > { %v1050_v36 = vadd.f32 %v1030_v23, %v974_v31  ;;  %v861_v40 = vsel %vm668_vm4, %v859_v29, %v860_v28  ;;  %v891_v41 = vmul.f32 %v1992_v59, %v528_v4  ;;  %v955_v42 = vrot.slane %v917_v24, 1 }
 0x197   : > { %v727_v39 = vadd.f32 %v719_v16, %v707_v34  ;;  %v956_v46 = vrot.slane %v918_v32, 1  ;;  %v573_v43 = vmul.f32 %v1967_v20, %v2213_v2  ;;  %v574_v45 = vmul.f32 %v1967_v20, %v2215_v63 }
 0x198   : > { %v1065_v44 = vadd.f32 %v2060_v33, %v1050_v36  ;;  %v1031_v48 = vrot.slane %v993_v35, 2  ;;  %v650_v49 = vmul.f32 %v1971_v27, %v2213_v2  ;;  %v651_v50 = vmul.f32 %v1971_v27, %v2215_v63 }
 0x199   : > { %v803_v47 = vadd.f32 %v785_v37, %v727_v39  ;;  %v1032_v51 = vrot.slane %v994_v38, 2  ;;  %v546_v54 = vmul.f32 %v1973_v30, %v2213_v2  ;;  %v613_v55 = vrot.slane %v573_v43, 1 }
 0x19a   : > { %1424 = vmatmul.mubr.msk.f32.gmra.mrb[4].mxu1 %vm481_vm1, %v1065_v44  ;;  %v614_v56 = vrot.slane %v574_v45, 1  ;;  %v690_v20 = vrot.slane %v650_v49, 2  ;;  %v691_v19 = vrot.slane %v651_v50, 2  ;;  %v747_v1 = vmul.f32 %v1994_v61, %v528_v4 }
 0x19b   : > { %v879_v57 = vadd.f32 %v861_v40, %v803_v47  ;;  %v748_v3 = vmul.f32 %v1994_v61, %v529_v6  ;;  %v823_v27 = vmul.f32 %v2007_v17, %v528_v4  ;;  %v824_v63 = vmul.f32 %v2007_v17, %v529_v6 }
 0x19c   : > { %v615_v60 = vsel %vm591_vm3, %v613_v55, %v614_v56  ;;  %v919_v14 = vmul.f32 %v1996_v62, %v530_v52  ;;  %v920_v30 = vmul.f32 %v1996_v62, %v531_v53  ;;  %v957_v2 = vsel %vm591_vm3, %v955_v42, %v956_v46 }
 0x19d   : > { %v899_v0 = vadd.f32 %v891_v41, %v879_v57  ;;  %v631_v15 = vadd.f32 %v615_v60, %v546_v54  ;;  %v692_v21 = vsel %vm668_vm4, %v690_v20, %v691_v19  ;;  %v786_v23 = vrot.slane %v747_v1, 1 }
 0x19e   : > { %v787_v25 = vrot.slane %v748_v3, 1  ;;  %v720_v61 = vmul.f32 %v1990_v58, %v528_v4  ;;  %v995_v31 = vmul.f32 %v2009_v18, %v530_v52  ;;  %v1033_v17 = vsel %vm668_vm4, %v1031_v48, %v1032_v51 }
 0x19f   : > { %v975_v26 = vadd.f32 %v957_v2, %v899_v0  ;;  %v708_v29 = vadd.f32 %v692_v21, %v631_v15  ;;  %v862_v6 = vrot.slane %v823_v27, 2  ;;  %v863_v22 = vrot.slane %v824_v63, 2 }
 0x1a0   : > { %v996_v28 = vmul.f32 %v2009_v18, %v531_v53  ;;  %v788_v34 = vsel %vm591_vm3, %v786_v23, %v787_v25  ;;  %v958_v16 = vrot.slane %v919_v14, 1  ;;  %v959_v32 = vrot.slane %v920_v30, 1 }
 0x1a1   : > { %v1051_v24 = vadd.f32 %v1033_v17, %v975_v26  ;;  %v728_v62 = vadd.f32 %v720_v61, %v708_v29  ;;  %v892_v37 = vmul.f32 %v1992_v59, %v530_v52  ;;  %v864_v58 = vsel %vm668_vm4, %v862_v6, %v863_v22  ;;  %v1358_v59 = vld [vmem:[%s2395_s6] ss:$0 sm:$0xff] }
 0x1a2   : > { %v1034_v4 = vrot.slane %v995_v31, 2  ;;  %v1035_v38 = vrot.slane %v996_v28, 2  ;;  %v960_v18 = vsel %vm591_vm3, %v958_v16, %v959_v32 }
 0x1a3   : > { %v1066_v35 = vadd.f32 %v2060_v33, %v1051_v24  ;;  %v804_v36 = vadd.f32 %v788_v34, %v728_v62 }
 0x1a4   : > { %v1036_v41 = vsel %vm668_vm4, %v1034_v4, %v1035_v38 }
 0x1a5   : > { %1426 = vmatprep.mubr.msk.f32.mxu1 %vm481_vm1, %v1066_v35  ;;  %v880_v39 = vadd.f32 %v864_v58, %v804_v36 }
 0x1a7   : > { %v900_v40 = vadd.f32 %v892_v37, %v880_v39 }
 0x1a9   : > { %v976_v42 = vadd.f32 %v960_v18, %v900_v40 }
 0x1ab   : > { %v1052_v44 = vadd.f32 %v1036_v41, %v976_v42 }
 0x1ad   : > { %v1067_v46 = vadd.f32 %v2060_v33, %v1052_v44 }
 0x1af   : > { %1427 = vmatmul.mubr.msk.f32.gmra.mrb[6].mxu1 %vm481_vm1, %v1067_v46 }
 0x244   : > { %v1419_v43 = vpop.f32.mrb[0].mxu1 }
 0x245   : > { %v1172_v45 = vadd.f32 %v1419_v43, %v1358_v59  ;;  %v1166_v47 = vpop.f32.mrb[1].mxu1 }
 0x246   : > { %v1167_v48 = vadd.f32 %v1358_v59, %v1166_v47 }
 0x247   : > { %v1206_v49 = vadd.f32 %v1172_v45, %v1913_v7 }
 0x248   : > { %v1205_v50 = vadd.f32 %v1167_v48, %v1909_v5 }
 0x249   : > { %v1214_v51 = vmax.f32 %v1206_v49, 0.0 }
 0x24a   : > { %v1213_v52 = vmax.f32 %v1205_v50, 0.0 }
 0x24b   : > { %1222 = vst.msk [vmem:[%s2314_s30 + $0x8] sm:$0xff] %vm343_vm0, %v1214_v51 }
 0x24c   : > { %1221 = vst.msk [vmem:[%s2314_s30] sm:$0xff] %vm343_vm0, %v1213_v52 }
 0x258   : > { %v1422_v33 = vpop.f32.mrb[2].mxu1 }
 0x259   : > { %v1182_v53 = vadd.f32 %v1422_v33, %v1358_v59  ;;  %v1176_v54 = vpop.f32.mrb[3].mxu1 }
 0x25a   : > { %v1177_v7 = vadd.f32 %v1358_v59, %v1176_v54 }
 0x25b   : > { %v1208_v5 = vadd.f32 %v1182_v53, %v1921_v9 }
 0x25c   : > { %v1207_v55 = vadd.f32 %v1177_v7, %v1915_v8 }
 0x25d   : > { %v1216_v56 = vmax.f32 %v1208_v5, 0.0 }
 0x25e   : > { %v1215_v57 = vmax.f32 %v1207_v55, 0.0 }
 0x25f   : > { %1224 = vst.msk [vmem:[%s2314_s30 + $0x18] sm:$0xff] %vm343_vm0, %v1216_v56 }
 0x260   : > { %1223 = vst.msk [vmem:[%s2314_s30 + $0x10] sm:$0xff] %vm343_vm0, %v1215_v57 }
 0x26d   : > { %v1425_v20 = vpop.f32.mrb[4].mxu1 }
 0x26e   : > { %v1192_v19 = vadd.f32 %v1425_v20, %v1358_v59  ;;  %v1186_v1 = vpop.f32.mrb[5].mxu1 }
 0x26f   : > { %v1187_v60 = vadd.f32 %v1358_v59, %v1186_v1 }
 0x270   : > { %v1210_v3 = vadd.f32 %v1192_v19, %v1929_v11 }
 0x271   : > { %v1209_v27 = vadd.f32 %v1187_v60, %v1923_v10 }
 0x272   : > { %v1218_v63 = vmax.f32 %v1210_v3, 0.0 }
 0x273   : > { %v1217_v9 = vmax.f32 %v1209_v27, 0.0 }
 0x274   : > { %1226 = vst.msk [vmem:[%s2314_s30 + $0x28] sm:$0xff] %vm343_vm0, %v1218_v63 }
 0x275   : > { %1225 = vst.msk [vmem:[%s2314_s30 + $0x20] sm:$0xff] %vm343_vm0, %v1217_v9 }
 0x282   : > { %v1428_v8 = vpop.f32.mrb[6].mxu1 }
 0x283   : > { %v1202_v0 = vadd.f32 %v1428_v8, %v1358_v59  ;;  %v1196_v15 = vpop.f32.mrb[7].mxu1 }
 0x284   : > { %v1197_v14 = vadd.f32 %v1358_v59, %v1196_v15 }
 0x285   : > { %v1212_v11 = vadd.f32 %v1202_v0, %v1937_v13 }
 0x286   : > { %v1211_v10 = vadd.f32 %v1197_v14, %v1931_v12 }
 0x287   : > { %v1220_v30 = vmax.f32 %v1212_v11, 0.0 }
 0x288   : > { %v1219_v2 = vmax.f32 %v1211_v10, 0.0 }
 0x289   : > { %1228 = vst.msk [vmem:[%s2314_s30 + $0x38] sm:$0xff] %vm343_vm0, %v1220_v30 }
 0x28a   : > { %1227 = vst.msk [vmem:[%s2314_s30 + $0x30] sm:$0xff] %vm343_vm0, %v1219_v2 }
 0x28b   : > { %1608 = shalt.err (!%p1605_p1)
}
 0x28c   : > { %s1609_s23 = scalar_lea.hbm %s2339_s13, 1024  ;;  %s1613_s30 = scalar_lea.hbm %s2396_s7, 2048 }
 0x28d   : > { %p1610_p13 = scmp.ne.s32.totalorder %s2339_s13, %s1609_s23  ;;  %p1614_p4 = scmp.lt.u32.totalorder %s2339_s13, %s2396_s7 }
 0x28e   : > { %p1615_p5 = scmp.lt.u32.totalorder %s1613_s30, %s1609_s23  ;;  %p1617_p11 = scmp.lt.u32.totalorder %s1609_s23, %s2339_s13 }
 0x28f   : > { %p1611_p6 = pnand %p1610_p13, %p2412_p0 }
 0x290   : > { %p1616_p8 = por %p1615_p5, %p1614_p4 }
 0x291   : > { %p1612_p10 = pneg %p1611_p6 }
 0x292   : > { %p1618_p2 = por %p1617_p11, %p1616_p8 }
 0x294   : > { %p1619_p3 = pnand %p1618_p2, %p1612_p10 }
 0x296   : > { %1622 = shalt.err (!%p1619_p3)
}
 0x297   : > { %s1674_s22 = smov 128   ;;  %s1675_s16 = smov 8  }
 0x298   : > { %1447 = dma.vmem_to_hbm [thread:$0]  (%p2412_p0), %s2341_s9, 1024, %s2339_s13, %s1230_s28, %s1674_s22, %s1674_s22, %s1675_s16  }
 0x299 PF: > { %s1258_s20 = sand.u32 1, %s1653_s24   ;;  %p2413_p7 = scmp.ne.s32.totalorder %s2402_s8, 0 }
 0x29a   : > { %p2414_p9 = scmp.ge.s32.totalorder %s1665_s27, 2  ;;  %s1259_s14 = scalar_lea.sflag [#allocation5], %s1258_s20 }
 0x29c   : > { %p1461_p12 = pnand %p2414_p9, %p2413_p7 }
 0x29e   : > { %1648 = dma.done.wait (!%p1461_p12), %s1259_s14, 1024  }
 0x29f   : > { %1650 = vsyncadd (!%p1461_p12), %s1259_s14, 4294966272  ;;  %p21_p1 = scmp.ge.s32.totalorder %s1830_s15, 4   ;;  %s2415_s24 = smov %s1657_s25 }
 0x2a0   : > { %s2416_s25 = smov %s1661_s26  ;;  %s2417_s26 = smov %s1846_s18 }
 0x2a1   : > { %s2418_s27 = smov %s1830_s15  ;;  %23 = sbr.rel (!%p21_p1) target bundleno = 6 (0x6), region = 102 }
 0x2a8   :  { %1264 = vsyncpa [#allocation4], 1 }
 0x2a9   :  { %1266 = vsyncpa [#allocation4 + $0x1], 1 }
 0x2aa   :  { %1267 = vsyncpa [#allocation7], 1 }
 0x2ab   :  { %1268 = vsyncpa [#allocation5], 1 }
 0x2ac   :  { %1270 = vsyncpa [#allocation5 + $0x1], 1 }

</bundles_post_ra>
